<compile_context>
chip_gen: v5e
topology: v5e:2x2
jax: 0.10.0
libtpu: 0.0.40
codegen_flags: <defaults>
</compile_context>

<pallas_src>
import functools
import math

import jax
import jax.numpy as jnp
from jax.experimental import pallas as pl
from jax.experimental.pallas import tpu as pltpu


def _clf_head_kernel(x_ref, w_ref, b_ref, o_ref):
    # Linear: z = x @ W' + b'   (f32 accumulation on the MXU; W' block-diag)
    z = jnp.dot(x_ref[...], w_ref[...], preferred_element_type=jnp.float32)
    z = z + b_ref[...]                      # broadcast bias [1, N'] over rows
    # Exact sigmoid (exp on the EUP; the divide is cheap — kernel is mem-bound).
    o_ref[...] = (1.0 / (1.0 + jnp.exp(-z))).astype(o_ref.dtype)


def _round_up(x, m):
    return ((x + m - 1) // m) * m


def _pick_replication(in_size, out_size, max_r=64, target_n=256,
                      max_w_bytes=8 * 1024 * 1024):
    """Smallest R with (R*out_size) % 128 == 0, doubled toward 256 lanes."""
    r = 128 // math.gcd(out_size, 128)
    if r > max_r:
        return 1
    while r * out_size < target_n and 2 * r <= max_r:
        r *= 2
    # Keep the replicated weight comfortably small in VMEM.
    while r > 1 and (r * in_size) * (r * out_size) * 4 > max_w_bytes:
        nr = r // 2
        if (nr * out_size) % 128 != 0:
            break
        r = nr
    if (r * in_size) * (r * out_size) * 4 > max_w_bytes:
        return 1
    return r


@functools.partial(jax.jit, static_argnames=("block_b",))
def parasite_words_clf_head(x, w, b, *, block_b=8192):
    """sigmoid(x @ w + b).  x: [B, in], w: [in, out], b: [out] -> [B, out]."""
    B, in_size = x.shape
    out_size = w.shape[1]

    # --- Block-diagonal replication: lane-dense x / output at zero extra HBM.
    R = _pick_replication(in_size, out_size)
    Bp = _round_up(max(B, 1), R)
    if Bp != B:
        x = jnp.pad(x, ((0, Bp - B), (0, 0)))
    rows = Bp // R
    k_rep = R * in_size
    n_rep = R * out_size

    xr = x.reshape(rows, k_rep)                                   # free view
    w_rep = jnp.kron(jnp.eye(R, dtype=w.dtype), w) if R > 1 else w
    b_rep = jnp.tile(b, R).reshape(1, n_rep)

    # --- Batch tiling: ~block_b original rows per step; keep >=4 steps when
    # the batch is large so both v7x TensorCores get work.
    tb_target = max(1, block_b // R)          # reshaped rows per grid step
    if rows <= tb_target:
        tb = rows                             # single tile == full array dim
    else:
        tb = min(_round_up(tb_target, 8), _round_up(-(-rows // 4), 8))
        tb = min(tb, rows)
    grid = (pl.cdiv(rows, tb),)

    bytes_per = jnp.dtype(x.dtype).itemsize
    cost = pl.CostEstimate(
        flops=2 * rows * k_rep * n_rep,
        transcendentals=rows * n_rep,
        bytes_accessed=bytes_per * (rows * k_rep + k_rep * n_rep
                                    + n_rep + rows * n_rep),
    )

    out_rep = pl.pallas_call(
        _clf_head_kernel,
        out_shape=jax.ShapeDtypeStruct((rows, n_rep), x.dtype),
        grid=grid,
        in_specs=[
            # Streamed x tile.  (If a profile ever shows exposed DMA here,
            # add pipeline_mode=pl.Buffered(3) to this spec only.)
            pl.BlockSpec((tb, k_rep), lambda i: (i, 0)),
            pl.BlockSpec((k_rep, n_rep), lambda i: (0, 0)),   # resident W'
            pl.BlockSpec((1, n_rep), lambda i: (0, 0)),       # resident b'
        ],
        out_specs=pl.BlockSpec((tb, n_rep), lambda i: (i, 0)),
        compiler_params=pltpu.CompilerParams(
            # Shard batch tiles across v7x's 2 TCs (no-op on v5e/v6e).
            dimension_semantics=("parallel",),
        ),
        cost_estimate=cost,
    )(xr, w_rep, b_rep)

    out = out_rep.reshape(Bp, out_size)
    return out[:B] if Bp != B else out


def _reference(x, w, b):
    return jax.nn.sigmoid(x @ w + b[None, :])


if __name__ == "__main__":
    key = jax.random.PRNGKey(0)
    kx, kw, kb = jax.random.split(key, 3)

    in_size, out_size = 32, 8
    # Deterministic "Linear" params (PyTorch shape is [out, in]; we build the
    # pre-transposed [in, out] form directly).
    w = jax.random.normal(kw, (in_size, out_size), dtype=jnp.float32) * 0.1
    b = jax.random.normal(kb, (out_size,), dtype=jnp.float32) * 0.1

    # 1) Small batch (B < R): exercises zero-row padding + tail slice.
    x1 = jax.random.normal(kx, (8, in_size), dtype=jnp.float32)
    y1 = jax.block_until_ready(parasite_words_clf_head(x1, w, b))
    assert y1.shape == (8, out_size)
    assert jnp.allclose(y1, _reference(x1, w, b), atol=2e-3, rtol=2e-3)

    # 2) Larger batch with a small block_b so the grid has several steps
    #    (exercises the pipelined / megacore-sharded path).
    x2 = jax.random.normal(jax.random.fold_in(kx, 1), (2048, in_size),
                           dtype=jnp.float32)
    y2 = jax.block_until_ready(parasite_words_clf_head(x2, w, b, block_b=256))
    assert y2.shape == (2048, out_size)
    assert jnp.allclose(y2, _reference(x2, w, b), atol=2e-3, rtol=2e-3)

    # 3) Batch not a multiple of R at the default tile size.
    x3 = jax.random.normal(jax.random.fold_in(kx, 2), (1000, in_size),
                           dtype=jnp.float32)
    y3 = jax.block_until_ready(parasite_words_clf_head(x3, w, b))
    assert y3.shape == (1000, out_size)
    assert jnp.allclose(y3, _reference(x3, w, b), atol=2e-3, rtol=2e-3)

    print("KERNEL_OK")
</pallas_src>

<mosaic_0001>
module attributes {stable_mosaic.version = 11 : i64} {
  func.func @_clf_head_kernel(%arg0: i32, %arg1: memref<1x1024xf32, #tpu.memory_space<vmem>>, %arg2: memref<1024x256xf32, #tpu.memory_space<vmem>>, %arg3: memref<1x256xf32, #tpu.memory_space<vmem>>, %arg4: memref<1x256xf32, #tpu.memory_space<vmem>>) attributes {dimension_semantics = [#tpu.dimension_semantics<parallel>], iteration_bounds = array<i64: 1>, scalar_prefetch = 0 : i64, scratch_operands = 0 : i64, tpu.core_type = #tpu.core_type<tc>, window_params = [{transform_indices = @transform_0, window_bounds = array<i64: 1, 1024>}, {pipeline_mode = #tpu.pipeline_mode<synchronous>, transform_indices = @transform_1, window_bounds = array<i64: 1024, 256>}, {pipeline_mode = #tpu.pipeline_mode<synchronous>, transform_indices = @transform_2, window_bounds = array<i64: 1, 256>}, {transform_indices = @transform_3, window_bounds = array<i64: 1, 256>}]} {
    %c0 = arith.constant 0 : index
    %c0_0 = arith.constant 0 : index
    %0 = vector.load %arg1[%c0, %c0_0] : memref<1x1024xf32, #tpu.memory_space<vmem>>, vector<1x1024xf32>
    %c0_1 = arith.constant 0 : index
    %c0_2 = arith.constant 0 : index
    %1 = vector.load %arg2[%c0_1, %c0_2] : memref<1024x256xf32, #tpu.memory_space<vmem>>, vector<1024x256xf32>
    %cst = arith.constant dense<0.000000e+00> : vector<1x256xf32>
    %2 = tpu.matmul %0, %1, %cst {dimension_numbers = #tpu.dot_dimension_numbers<[1], [0], [0], [1], [0, 0, 1, 1], [], []>} : vector<1x1024xf32>, vector<1024x256xf32>, vector<1x256xf32> -> vector<1x256xf32>
    %c0_3 = arith.constant 0 : index
    %c0_4 = arith.constant 0 : index
    %3 = vector.load %arg3[%c0_3, %c0_4] : memref<1x256xf32, #tpu.memory_space<vmem>>, vector<1x256xf32>
    %4 = arith.addf %2, %3 : vector<1x256xf32>
    %cst_5 = arith.constant 0.000000e+00 : f32
    %5 = vector.broadcast %cst_5 : f32 to vector<1x256xf32>
    %6 = arith.subf %5, %4 : vector<1x256xf32>
    %7 = math.exp %6 : vector<1x256xf32>
    %cst_6 = arith.constant 1.000000e+00 : f32
    %8 = vector.broadcast %cst_6 : f32 to vector<1x256xf32>
    %9 = arith.addf %8, %7 : vector<1x256xf32>
    %cst_7 = arith.constant 1.000000e+00 : f32
    %10 = vector.broadcast %cst_7 : f32 to vector<1x256xf32>
    %11 = arith.divf %10, %9 : vector<1x256xf32>
    %c0_8 = arith.constant 0 : index
    %c0_9 = arith.constant 0 : index
    %12 = vector.load %arg4[%c0_8, %c0_9] : memref<1x256xf32, #tpu.memory_space<vmem>>, vector<1x256xf32>
    tpu.vector_store %arg4[%c0_8, %c0_9], %11 {strides = array<i32>} : memref<1x256xf32, #tpu.memory_space<vmem>>, vector<1x256xf32>,
    return
  }
  func.func @transform_0(%arg0: i32) -> (i32, i32) {
    %c0_i32 = arith.constant 0 : i32
    %c0_i32_0 = arith.constant 0 : i32
    return %arg0, %c0_i32 : i32, i32
  }
  func.func @transform_1(%arg0: i32) -> (i32, i32) {
    %c0_i32 = arith.constant 0 : i32
    %c0_i32_0 = arith.constant 0 : i32
    %c0_i32_1 = arith.constant 0 : i32
    return %c0_i32, %c0_i32_0 : i32, i32
  }
  func.func @transform_2(%arg0: i32) -> (i32, i32) {
    %c0_i32 = arith.constant 0 : i32
    %c0_i32_0 = arith.constant 0 : i32
    %c0_i32_1 = arith.constant 0 : i32
    return %c0_i32, %c0_i32_0 : i32, i32
  }
  func.func @transform_3(%arg0: i32) -> (i32, i32) {
    %c0_i32 = arith.constant 0 : i32
    %c0_i32_0 = arith.constant 0 : i32
    return %arg0, %c0_i32 : i32, i32
  }
}

</mosaic_0001>

<bundles_post_ra>
// kernel: tile.8
= control target key start
LH: loop header
LB: loop body
LE: loop exit
PB: predicated region body
PF: predicated region fallthrough
CT: control target
= control target key end

     0   :  { %s40_s0 = inlined_call_operand.vmem [shape: f32[8], index: 0, kind: input, shape index: {}]   ;;  %s41_s1 = inlined_call_operand.vmem [shape: f32[32,8], index: 1, kind: output, shape index: {}]  }
   0x1   :  { %v4_v0 = vld [vmem:[%s40_s0] ss:$0 sm:$0xff] }
   0x2   :  { %5 = vst [vmem:[%s41_s1] sm:$0xff] %v4_v0 }
   0x3   :  { %12 = vst [vmem:[%s41_s1 + $0x8] sm:$0xff] %v4_v0 }
   0x4   :  { %13 = vst [vmem:[%s41_s1 + $0x10] sm:$0xff] %v4_v0 }
   0x5   :  { %14 = vst [vmem:[%s41_s1 + $0x18] sm:$0xff] %v4_v0 }

// kernel: tile.9
= control target key start
LH: loop header
LB: loop body
LE: loop exit
PB: predicated region body
PF: predicated region fallthrough
CT: control target
= control target key end

     0   :  { %s7_s6 = smov 3  ;;  %s21_s9 = smov 3  ;;  %vm4_vm0 = vcmask 64512   ;;  %vm11_vm1 = vcmask 1048512   ;;  %vm18_vm2 = vcmask 982912   ;;  %vm25_vm3 = vcmask 917312   ;;  %s233_s0 = inlined_call_operand.vmem [shape: f32[32,8], index: 0, kind: input, shape index: {}]   ;;  %s234_s1 = inlined_call_operand.vmem [shape: f32[1,256], index: 1, kind: output, shape index: {}]  }
   0x1   :  { %v123_v0 = vld [vmem:[%s233_s0 + $0xf] ss:$16 sm:%s7_s6]   ;;  %s154_s10 = smov 120   ;;  %v125_v1 = vld [vmem:[%s233_s0 + $0xd] ss:$16 sm:%s21_s9]   ;;  %s155_s13 = smov 104  }
   0x2   :  { %9 = vrot.lane.b32.xlu0 %v123_v0, %s154_s10  ;;  %23 = vrot.lane.b32.xlu1 %v125_v1, %s155_s13  ;;  %s14_s14 = smov 3  ;;  %s28_s15 = smov 3  ;;  %vm32_vm4 = vcmask 851712   ;;  %vm39_vm5 = vcmask 786112   ;;  %vm46_vm6 = vcmask 720512   ;;  %vm53_vm7 = vcmask 654912  }
   0x3   :  { %v124_v2 = vld [vmem:[%s233_s0 + $0xe] ss:$16 sm:%s14_s14]   ;;  %v126_v3 = vld [vmem:[%s233_s0 + $0xc] ss:$16 sm:%s28_s15]   ;;  %s35_s20 = smov 3  ;;  %s156_s23 = smov 112  }
   0x4   :  { %v127_v4 = vld [vmem:[%s233_s0 + $0xb] ss:$16 sm:%s35_s20]   ;;  %s157_s24 = smov 88   ;;  %s158_s25 = smov 96   ;;  %vm60_vm8 = vcmask 589312   ;;  %vm67_vm9 = vcmask 523712  }
   0x5   :  { %37 = vrot.lane.b32.xlu2 %v127_v4, %s157_s24  ;;  %s49_s26 = smov 3  ;;  %s42_s27 = smov 3  ;;  %vm74_vm10 = vcmask 458112   ;;  %vm81_vm11 = vcmask 392512   ;;  %vm88_vm12 = vcmask 326912   ;;  %vm95_vm13 = vcmask 261312  }
   0x6   :  { %s56_s28 = smov 3  ;;  %v129_v5 = vld [vmem:[%s233_s0 + $0x9] ss:$16 sm:%s49_s26]   ;;  %v128_v6 = vld [vmem:[%s233_s0 + $0xa] ss:$16 sm:%s42_s27]   ;;  %s159_s6 = smov 72  }
   0x7   :  { %v130_v7 = vld [vmem:[%s233_s0 + $0x8] ss:$16 sm:%s56_s28]   ;;  %s160_s7 = smov 80   ;;  %s161_s8 = smov 64   ;;  %vm102_vm14 = vcmask 195712   ;;  %vm109_vm15 = vcmask 130112  }
   0x8   :  { %s70_s9 = smov 3  ;;  %s63_s10 = smov 3 }
   0x9   :  { %s77_s11 = smov 3  ;;  %v132_v8 = vld [vmem:[%s233_s0 + $0x6] ss:$16 sm:%s70_s9]   ;;  %v131_v9 = vld [vmem:[%s233_s0 + $0x7] ss:$16 sm:%s63_s10]   ;;  %s162_s18 = smov 48  }
   0xa   :  { %16 = vrot.lane.b32.xlu0 %v124_v2, %s156_s23  ;;  %30 = vrot.lane.b32.xlu1 %v126_v3, %s158_s25  ;;  %v133_v10 = vld [vmem:[%s233_s0 + $0x5] ss:$16 sm:%s77_s11]   ;;  %s163_s19 = smov 56   ;;  %s164_s20 = smov 40  }
   0xb   :  { %s91_s21 = smov 3  ;;  %s84_s22 = smov 3 }
   0xc   :  { %s98_s23 = smov 3  ;;  %v135_v11 = vld [vmem:[%s233_s0 + $0x3] ss:$16 sm:%s91_s21]   ;;  %v134_v12 = vld [vmem:[%s233_s0 + $0x4] ss:$16 sm:%s84_s22]   ;;  %s165_s30 = smov 24  }
   0xd   :  { %44 = vrot.lane.b32.xlu2 %v128_v6, %s160_s7  ;;  %v136_v13 = vld [vmem:[%s233_s0 + $0x2] ss:$16 sm:%s98_s23]   ;;  %s166_s2 = smov 32   ;;  %s167_s3 = smov 16  }
   0xe   :  { %s105_s4 = smov 3  ;;  %s168_s7 = smov 8  }
   0xf   :  { %v137_v14 = vld [vmem:[%s233_s0 + $0x1] ss:$16 sm:%s105_s4]  }
  0x12   :  { %51 = vrot.lane.b32.xlu0 %v129_v5, %s159_s6  ;;  %58 = vrot.lane.b32.xlu1 %v130_v7, %s161_s8  ;;  %s2_s8 = smov 3 }
  0x13   :  { %v3_v15 = vld [vmem:[%s233_s0] ss:$16 sm:%s2_s8]  }
  0x14   :  { %5 = vst.msk [vmem:[#allocation0] ss:$8 sm:$0x3] %vm4_vm0, %v3_v15  }
  0x15   :  { %65 = vrot.lane.b32.xlu2 %v131_v9, %s163_s19 }
  0x1a   :  { %72 = vrot.lane.b32.xlu0 %v132_v8, %s162_s18  ;;  %79 = vrot.lane.b32.xlu1 %v133_v10, %s164_s20 }
  0x1d   :  { %86 = vrot.lane.b32.xlu2 %v134_v12, %s166_s2 }
  0x22   :  { %93 = vrot.lane.b32.xlu0 %v135_v11, %s165_s30  ;;  %100 = vrot.lane.b32.xlu1 %v136_v13, %s167_s3 }
  0x25   :  { %107 = vrot.lane.b32.xlu2 %v137_v14, %s168_s7 }
  0x5f   :  { %v38_v16 = vpop.permute.xlu2 %37  }
  0x67   :  { %v45_v17 = vpop.permute.xlu2 %44  }
  0x6f   :  { %v66_v19 = vpop.permute.xlu2 %65  }
  0x74   :  { %v10_v18 = vpop.permute.xlu0 %9   ;;  %v24_v20 = vpop.permute.xlu1 %23  }
  0x75   :  { %12 = vst.msk [vmem:[#allocation0] ss:$8 sm:$0x3] %vm11_vm1, %v10_v18  }
  0x77   :  { %v87_v22 = vpop.permute.xlu2 %86  }
  0x7c   :  { %v17_v21 = vpop.permute.xlu0 %16   ;;  %v31_v23 = vpop.permute.xlu1 %30  }
  0x7d   :  { %19 = vst.msk [vmem:[#allocation0] ss:$8 sm:$0x3] %vm18_vm2, %v17_v21  }
  0x7e   :  { %26 = vst.msk [vmem:[#allocation0] ss:$8 sm:$0x3] %vm25_vm3, %v24_v20  }
  0x7f   :  { %33 = vst.msk [vmem:[#allocation0] ss:$8 sm:$0x3] %vm32_vm4, %v31_v23   ;;  %v108_v25 = vpop.permute.xlu2 %107  }
  0x80   :  { %40 = vst.msk [vmem:[#allocation0] ss:$8 sm:$0x3] %vm39_vm5, %v38_v16  }
  0x81   :  { %47 = vst.msk [vmem:[#allocation0] ss:$8 sm:$0x3] %vm46_vm6, %v45_v17  }
  0x84   :  { %v52_v24 = vpop.permute.xlu0 %51   ;;  %v59_v26 = vpop.permute.xlu1 %58  }
  0x85   :  { %54 = vst.msk [vmem:[#allocation0] ss:$8 sm:$0x3] %vm53_vm7, %v52_v24  }
  0x86   :  { %61 = vst.msk [vmem:[#allocation0] ss:$8 sm:$0x3] %vm60_vm8, %v59_v26  }
  0x87   :  { %68 = vst.msk [vmem:[#allocation0] ss:$8 sm:$0x3] %vm67_vm9, %v66_v19  }
  0x8c   :  { %v73_v27 = vpop.permute.xlu0 %72   ;;  %v80_v28 = vpop.permute.xlu1 %79  }
  0x8d   :  { %75 = vst.msk [vmem:[#allocation0] ss:$8 sm:$0x3] %vm74_vm10, %v73_v27  }
  0x8e   :  { %82 = vst.msk [vmem:[#allocation0] ss:$8 sm:$0x3] %vm81_vm11, %v80_v28  }
  0x8f   :  { %89 = vst.msk [vmem:[#allocation0] ss:$8 sm:$0x3] %vm88_vm12, %v87_v22  }
  0x94   :  { %v94_v29 = vpop.permute.xlu0 %93   ;;  %v101_v30 = vpop.permute.xlu1 %100  }
  0x95   :  { %96 = vst.msk [vmem:[#allocation0] ss:$8 sm:$0x3] %vm95_vm13, %v94_v29  }
  0x96   :  { %103 = vst.msk [vmem:[#allocation0] ss:$8 sm:$0x3] %vm102_vm14, %v101_v30  }
  0x97   :  { %110 = vst.msk [vmem:[#allocation0] ss:$8 sm:$0x3] %vm109_vm15, %v108_v25  }
  0x9e   :  { %v113_v31 = vld [vmem:[#allocation0] sm:$0x1]  ;;  %v118_v32 = vld [vmem:[#allocation0 + $0x8] sm:$0x1] }
  0x9f   :  { %116 = vst [vmem:[%s234_s1] sm:$0x1] %v113_v31 }
  0xa0   :  { %138 = vst [vmem:[%s234_s1 + $0x1] sm:$0x1] %v118_v32 }

// kernel: parasite_words_clf_head.1
= control target key start
LH: loop header
LB: loop body
LE: loop exit
PB: predicated region body
PF: predicated region fallthrough
CT: control target
= control target key end

     0   :  { %vm655_vm7 = vcmask 1040384   ;;  %s1520_s1 = inlined_call_operand.vmem [shape: f32[1024,256], index: 1, kind: input, shape index: {}]   ;;  %s1521_s0 = inlined_call_operand.vmem [shape: f32[1,1024], index: 0, kind: input, shape index: {}]   ;;  %s1522_s2 = inlined_call_operand.vmem [shape: f32[1,256], index: 2, kind: input, shape index: {}]   ;;  %s1523_s3 = inlined_call_operand.vmem [shape: f32[1,256], index: 3, kind: output, shape index: {}]  }
   0x1   :  { %v109_v0 = vld [vmem:[%s1520_s1 + $0x2f0] sm:$0xff]  ;;  %v107_v2 = vld [vmem:[%s1520_s1 + $0x2e0] sm:$0xff] }
   0x2   :  { %v45_v1 = vld [vmem:[%s1520_s1 + $0xf0] sm:$0xff]  ;;  %334 = vmatpush.msra.mxu2 %v109_v0  ;;  %v43_v4 = vld [vmem:[%s1520_s1 + $0xe0] sm:$0xff] }
   0x3   :  { %294 = vmatpush.msra.mxu0 %v45_v1  ;;  %v141_v3 = vld [vmem:[%s1520_s1 + $0x3f0] sm:$0xff]  ;;  %v139_v7 = vld [vmem:[%s1520_s1 + $0x3e0] sm:$0xff] }
   0x4   :  { %v77_v5 = vld [vmem:[%s1520_s1 + $0x1f0] sm:$0xff]  ;;  %354 = vmatpush.msra.mxu3 %v141_v3  ;;  %335 = vmatpush.msra.mxu2 %v107_v2  ;;  %v75_v9 = vld [vmem:[%s1520_s1 + $0x1e0] sm:$0xff] }
   0x5   :  { %314 = vmatpush.msra.mxu1 %v77_v5  ;;  %v105_v6 = vld [vmem:[%s1520_s1 + $0x2d0] sm:$0xff]  ;;  %295 = vmatpush.msra.mxu0 %v43_v4  ;;  %v103_v11 = vld [vmem:[%s1520_s1 + $0x2c0] sm:$0xff] }
   0x6   :  { %v41_v8 = vld [vmem:[%s1520_s1 + $0xd0] sm:$0xff]  ;;  %355 = vmatpush.msra.mxu3 %v139_v7  ;;  %v39_v12 = vld [vmem:[%s1520_s1 + $0xc0] sm:$0xff]  ;;  %336 = vmatpush.msra.mxu2 %v105_v6 }
   0x7   :  { %v137_v10 = vld [vmem:[%s1520_s1 + $0x3d0] sm:$0xff]  ;;  %315 = vmatpush.msra.mxu1 %v75_v9  ;;  %296 = vmatpush.msra.mxu0 %v41_v8  ;;  %v135_v14 = vld [vmem:[%s1520_s1 + $0x3c0] sm:$0xff] }
   0x8   :  { %v73_v13 = vld [vmem:[%s1520_s1 + $0x1d0] sm:$0xff]  ;;  %v71_v15 = vld [vmem:[%s1520_s1 + $0x1c0] sm:$0xff]  ;;  %356 = vmatpush.msra.mxu3 %v137_v10  ;;  %337 = vmatpush.msra.mxu2 %v103_v11 }
   0x9   :  { %316 = vmatpush.msra.mxu1 %v73_v13  ;;  %v101_v16 = vld [vmem:[%s1520_s1 + $0x2b0] sm:$0xff]  ;;  %297 = vmatpush.msra.mxu0 %v39_v12  ;;  %v99_v20 = vld [vmem:[%s1520_s1 + $0x2a0] sm:$0xff] }
   0xa   :  { %v37_v17 = vld [vmem:[%s1520_s1 + $0xb0] sm:$0xff]  ;;  %357 = vmatpush.msra.mxu3 %v135_v14  ;;  %v35_v21 = vld [vmem:[%s1520_s1 + $0xa0] sm:$0xff]  ;;  %338 = vmatpush.msra.mxu2 %v101_v16 }
   0xb   :  { %v133_v18 = vld [vmem:[%s1520_s1 + $0x3b0] sm:$0xff]  ;;  %317 = vmatpush.msra.mxu1 %v71_v15  ;;  %298 = vmatpush.msra.mxu0 %v37_v17  ;;  %v131_v22 = vld [vmem:[%s1520_s1 + $0x3a0] sm:$0xff] }
   0xc   :  { %v69_v19 = vld [vmem:[%s1520_s1 + $0x1b0] sm:$0xff]  ;;  %v67_v23 = vld [vmem:[%s1520_s1 + $0x1a0] sm:$0xff]  ;;  %358 = vmatpush.msra.mxu3 %v133_v18  ;;  %339 = vmatpush.msra.mxu2 %v99_v20 }
   0xd   :  { %318 = vmatpush.msra.mxu1 %v69_v19  ;;  %v97_v24 = vld [vmem:[%s1520_s1 + $0x290] sm:$0xff]  ;;  %299 = vmatpush.msra.mxu0 %v35_v21  ;;  %v95_v28 = vld [vmem:[%s1520_s1 + $0x280] sm:$0xff] }
   0xe   :  { %v33_v25 = vld [vmem:[%s1520_s1 + $0x90] sm:$0xff]  ;;  %359 = vmatpush.msra.mxu3 %v131_v22  ;;  %v31_v29 = vld [vmem:[%s1520_s1 + $0x80] sm:$0xff]  ;;  %340 = vmatpush.msra.mxu2 %v97_v24 }
   0xf   :  { %v129_v26 = vld [vmem:[%s1520_s1 + $0x390] sm:$0xff]  ;;  %319 = vmatpush.msra.mxu1 %v67_v23  ;;  %300 = vmatpush.msra.mxu0 %v33_v25  ;;  %v127_v30 = vld [vmem:[%s1520_s1 + $0x380] sm:$0xff] }
  0x10   :  { %v65_v27 = vld [vmem:[%s1520_s1 + $0x190] sm:$0xff]  ;;  %v63_v31 = vld [vmem:[%s1520_s1 + $0x180] sm:$0xff]  ;;  %360 = vmatpush.msra.mxu3 %v129_v26  ;;  %341 = vmatpush.msra.mxu2 %v95_v28 }
  0x11   :  { %320 = vmatpush.msra.mxu1 %v65_v27  ;;  %v93_v32 = vld [vmem:[%s1520_s1 + $0x270] sm:$0xff]  ;;  %301 = vmatpush.msra.mxu0 %v31_v29  ;;  %v91_v36 = vld [vmem:[%s1520_s1 + $0x260] sm:$0xff] }
  0x12   :  { %v29_v33 = vld [vmem:[%s1520_s1 + $0x70] sm:$0xff]  ;;  %361 = vmatpush.msra.mxu3 %v127_v30  ;;  %v27_v37 = vld [vmem:[%s1520_s1 + $0x60] sm:$0xff]  ;;  %342 = vmatpush.msra.mxu2 %v93_v32 }
  0x13   :  { %v125_v34 = vld [vmem:[%s1520_s1 + $0x370] sm:$0xff]  ;;  %321 = vmatpush.msra.mxu1 %v63_v31  ;;  %302 = vmatpush.msra.mxu0 %v29_v33  ;;  %v123_v38 = vld [vmem:[%s1520_s1 + $0x360] sm:$0xff] }
  0x14   :  { %v61_v35 = vld [vmem:[%s1520_s1 + $0x170] sm:$0xff]  ;;  %v59_v39 = vld [vmem:[%s1520_s1 + $0x160] sm:$0xff]  ;;  %362 = vmatpush.msra.mxu3 %v125_v34  ;;  %343 = vmatpush.msra.mxu2 %v91_v36 }
  0x15   :  { %322 = vmatpush.msra.mxu1 %v61_v35  ;;  %v89_v40 = vld [vmem:[%s1520_s1 + $0x250] sm:$0xff]  ;;  %303 = vmatpush.msra.mxu0 %v27_v37  ;;  %v87_v44 = vld [vmem:[%s1520_s1 + $0x240] sm:$0xff] }
  0x16   :  { %v25_v41 = vld [vmem:[%s1520_s1 + $0x50] sm:$0xff]  ;;  %363 = vmatpush.msra.mxu3 %v123_v38  ;;  %v23_v45 = vld [vmem:[%s1520_s1 + $0x40] sm:$0xff]  ;;  %344 = vmatpush.msra.mxu2 %v89_v40 }
  0x17   :  { %v121_v42 = vld [vmem:[%s1520_s1 + $0x350] sm:$0xff]  ;;  %323 = vmatpush.msra.mxu1 %v59_v39  ;;  %304 = vmatpush.msra.mxu0 %v25_v41  ;;  %v119_v46 = vld [vmem:[%s1520_s1 + $0x340] sm:$0xff] }
  0x18   :  { %v57_v43 = vld [vmem:[%s1520_s1 + $0x150] sm:$0xff]  ;;  %v55_v47 = vld [vmem:[%s1520_s1 + $0x140] sm:$0xff]  ;;  %364 = vmatpush.msra.mxu3 %v121_v42  ;;  %345 = vmatpush.msra.mxu2 %v87_v44 }
  0x19   :  { %324 = vmatpush.msra.mxu1 %v57_v43  ;;  %v85_v48 = vld [vmem:[%s1520_s1 + $0x230] sm:$0xff]  ;;  %305 = vmatpush.msra.mxu0 %v23_v45  ;;  %v83_v52 = vld [vmem:[%s1520_s1 + $0x220] sm:$0xff] }
  0x1a   :  { %v21_v49 = vld [vmem:[%s1520_s1 + $0x30] sm:$0xff]  ;;  %365 = vmatpush.msra.mxu3 %v119_v46  ;;  %v19_v53 = vld [vmem:[%s1520_s1 + $0x20] sm:$0xff]  ;;  %346 = vmatpush.msra.mxu2 %v85_v48 }
  0x1b   :  { %v117_v50 = vld [vmem:[%s1520_s1 + $0x330] sm:$0xff]  ;;  %325 = vmatpush.msra.mxu1 %v55_v47  ;;  %306 = vmatpush.msra.mxu0 %v21_v49  ;;  %v115_v54 = vld [vmem:[%s1520_s1 + $0x320] sm:$0xff] }
  0x1c   :  { %v53_v51 = vld [vmem:[%s1520_s1 + $0x130] sm:$0xff]  ;;  %v51_v55 = vld [vmem:[%s1520_s1 + $0x120] sm:$0xff]  ;;  %366 = vmatpush.msra.mxu3 %v117_v50  ;;  %347 = vmatpush.msra.mxu2 %v83_v52 }
  0x1d   :  { %326 = vmatpush.msra.mxu1 %v53_v51  ;;  %v81_v56 = vld [vmem:[%s1520_s1 + $0x210] sm:$0xff]  ;;  %307 = vmatpush.msra.mxu0 %v19_v53  ;;  %v79_v60 = vld [vmem:[%s1520_s1 + $0x200] sm:$0xff] }
  0x1e   :  { %v17_v57 = vld [vmem:[%s1520_s1 + $0x10] sm:$0xff]  ;;  %367 = vmatpush.msra.mxu3 %v115_v54  ;;  %v15_v61 = vld [vmem:[%s1520_s1] sm:$0xff]  ;;  %348 = vmatpush.msra.mxu2 %v81_v56 }
  0x1f   :  { %v113_v58 = vld [vmem:[%s1520_s1 + $0x310] sm:$0xff]  ;;  %327 = vmatpush.msra.mxu1 %v51_v55  ;;  %308 = vmatpush.msra.mxu0 %v17_v57  ;;  %v111_v63 = vld [vmem:[%s1520_s1 + $0x300] sm:$0xff] }
  0x20   :  { %v49_v59 = vld [vmem:[%s1520_s1 + $0x110] sm:$0xff]  ;;  %368 = vmatpush.msra.mxu3 %v113_v58  ;;  %349 = vmatpush.msra.mxu2 %v79_v60  ;;  %v235_v2 = vld [vmem:[%s1520_s1 + $0x6e0] sm:$0xff] }
  0x21   :  { %v237_v62 = vld [vmem:[%s1520_s1 + $0x6f0] sm:$0xff]  ;;  %328 = vmatpush.msra.mxu1 %v49_v59  ;;  %309 = vmatpush.msra.mxu0 %v15_v61  ;;  %v47_v3 = vld [vmem:[%s1520_s1 + $0x100] sm:$0xff] }
  0x22   :  { %v173_v0 = vld [vmem:[%s1520_s1 + $0x4f0] sm:$0xff]  ;;  %414 = vmatpush.msrb.mxu2 %v237_v62  ;;  %369 = vmatpush.msra.mxu3 %v111_v63  ;;  %v171_v4 = vld [vmem:[%s1520_s1 + $0x4e0] sm:$0xff] }
  0x23   :  { %v269_v1 = vld [vmem:[%s1520_s1 + $0x7f0] sm:$0xff]  ;;  %374 = vmatpush.msrb.mxu0 %v173_v0  ;;  %v267_v7 = vld [vmem:[%s1520_s1 + $0x7e0] sm:$0xff]  ;;  %329 = vmatpush.msra.mxu1 %v47_v3  ;;  %v110_v3 = vld [vmem:[%s1520_s1 + $0x2f8] sm:$0xff] }
  0x24   :  { %v205_v5 = vld [vmem:[%s1520_s1 + $0x5f0] sm:$0xff]  ;;  %434 = vmatpush.msrb.mxu3 %v269_v1  ;;  %415 = vmatpush.msrb.mxu2 %v235_v2  ;;  %v203_v9 = vld [vmem:[%s1520_s1 + $0x5e0] sm:$0xff] }
  0x25   :  { %v233_v6 = vld [vmem:[%s1520_s1 + $0x6d0] sm:$0xff]  ;;  %375 = vmatpush.msrb.mxu0 %v171_v4  ;;  %394 = vmatpush.msrb.mxu1 %v205_v5  ;;  %v231_v10 = vld [vmem:[%s1520_s1 + $0x6c0] sm:$0xff] }
  0x26   :  { %v169_v8 = vld [vmem:[%s1520_s1 + $0x4d0] sm:$0xff]  ;;  %416 = vmatpush.msrb.mxu2 %v233_v6  ;;  %435 = vmatpush.msrb.mxu3 %v267_v7  ;;  %v167_v12 = vld [vmem:[%s1520_s1 + $0x4c0] sm:$0xff] }
  0x27   :  { %v265_v11 = vld [vmem:[%s1520_s1 + $0x7d0] sm:$0xff]  ;;  %376 = vmatpush.msrb.mxu0 %v169_v8  ;;  %395 = vmatpush.msrb.mxu1 %v203_v9  ;;  %v263_v15 = vld [vmem:[%s1520_s1 + $0x7c0] sm:$0xff]  ;;  %v46_v8 = vld [vmem:[%s1520_s1 + $0xf8] sm:$0xff] }
  0x28   :  { %v201_v13 = vld [vmem:[%s1520_s1 + $0x5d0] sm:$0xff]  ;;  %417 = vmatpush.msrb.mxu2 %v231_v10  ;;  %436 = vmatpush.msrb.mxu3 %v265_v11  ;;  %v199_v17 = vld [vmem:[%s1520_s1 + $0x5c0] sm:$0xff]  ;;  %v108_v9 = vld [vmem:[%s1520_s1 + $0x2e8] sm:$0xff] }
  0x29   :  { %v229_v14 = vld [vmem:[%s1520_s1 + $0x6b0] sm:$0xff]  ;;  %377 = vmatpush.msrb.mxu0 %v167_v12  ;;  %396 = vmatpush.msrb.mxu1 %v201_v13  ;;  %v227_v18 = vld [vmem:[%s1520_s1 + $0x6a0] sm:$0xff]  ;;  %v142_v10 = vld [vmem:[%s1520_s1 + $0x3f8] sm:$0xff] }
  0x2a   :  { %v165_v16 = vld [vmem:[%s1520_s1 + $0x4b0] sm:$0xff]  ;;  %418 = vmatpush.msrb.mxu2 %v229_v14  ;;  %437 = vmatpush.msrb.mxu3 %v263_v15  ;;  %v163_v20 = vld [vmem:[%s1520_s1 + $0x4a0] sm:$0xff]  ;;  %v44_v13 = vld [vmem:[%s1520_s1 + $0xe8] sm:$0xff] }
  0x2b   :  { %v261_v19 = vld [vmem:[%s1520_s1 + $0x7b0] sm:$0xff]  ;;  %378 = vmatpush.msrb.mxu0 %v165_v16  ;;  %397 = vmatpush.msrb.mxu1 %v199_v17  ;;  %v259_v23 = vld [vmem:[%s1520_s1 + $0x7a0] sm:$0xff]  ;;  %v106_v14 = vld [vmem:[%s1520_s1 + $0x2d8] sm:$0xff] }
  0x2c   :  { %v197_v21 = vld [vmem:[%s1520_s1 + $0x5b0] sm:$0xff]  ;;  %419 = vmatpush.msrb.mxu2 %v227_v18  ;;  %438 = vmatpush.msrb.mxu3 %v261_v19  ;;  %v195_v25 = vld [vmem:[%s1520_s1 + $0x5a0] sm:$0xff]  ;;  %v78_v15 = vld [vmem:[%s1520_s1 + $0x1f8] sm:$0xff] }
  0x2d   :  { %v225_v22 = vld [vmem:[%s1520_s1 + $0x690] sm:$0xff]  ;;  %379 = vmatpush.msrb.mxu0 %v163_v20  ;;  %398 = vmatpush.msrb.mxu1 %v197_v21  ;;  %v223_v26 = vld [vmem:[%s1520_s1 + $0x680] sm:$0xff]  ;;  %v140_v16 = vld [vmem:[%s1520_s1 + $0x3e8] sm:$0xff] }
  0x2e   :  { %v161_v24 = vld [vmem:[%s1520_s1 + $0x490] sm:$0xff]  ;;  %420 = vmatpush.msrb.mxu2 %v225_v22  ;;  %439 = vmatpush.msrb.mxu3 %v259_v23  ;;  %v159_v28 = vld [vmem:[%s1520_s1 + $0x480] sm:$0xff]  ;;  %v42_v17 = vld [vmem:[%s1520_s1 + $0xd8] sm:$0xff] }
  0x2f   :  { %v257_v27 = vld [vmem:[%s1520_s1 + $0x790] sm:$0xff]  ;;  %380 = vmatpush.msrb.mxu0 %v161_v24  ;;  %399 = vmatpush.msrb.mxu1 %v195_v25  ;;  %v255_v31 = vld [vmem:[%s1520_s1 + $0x780] sm:$0xff]  ;;  %v104_v18 = vld [vmem:[%s1520_s1 + $0x2c8] sm:$0xff] }
  0x30   :  { %v193_v29 = vld [vmem:[%s1520_s1 + $0x590] sm:$0xff]  ;;  %421 = vmatpush.msrb.mxu2 %v223_v26  ;;  %440 = vmatpush.msrb.mxu3 %v257_v27  ;;  %v191_v33 = vld [vmem:[%s1520_s1 + $0x580] sm:$0xff]  ;;  %v76_v19 = vld [vmem:[%s1520_s1 + $0x1e8] sm:$0xff] }
  0x31   :  { %v221_v30 = vld [vmem:[%s1520_s1 + $0x670] sm:$0xff]  ;;  %381 = vmatpush.msrb.mxu0 %v159_v28  ;;  %400 = vmatpush.msrb.mxu1 %v193_v29  ;;  %v219_v34 = vld [vmem:[%s1520_s1 + $0x660] sm:$0xff]  ;;  %v138_v20 = vld [vmem:[%s1520_s1 + $0x3d8] sm:$0xff] }
  0x32   :  { %v157_v32 = vld [vmem:[%s1520_s1 + $0x470] sm:$0xff]  ;;  %422 = vmatpush.msrb.mxu2 %v221_v30  ;;  %441 = vmatpush.msrb.mxu3 %v255_v31  ;;  %v155_v36 = vld [vmem:[%s1520_s1 + $0x460] sm:$0xff]  ;;  %v40_v21 = vld [vmem:[%s1520_s1 + $0xc8] sm:$0xff] }
  0x33   :  { %v253_v35 = vld [vmem:[%s1520_s1 + $0x770] sm:$0xff]  ;;  %v1004_v38 = vld [vmem:[%s1521_s0] sm:$0xff]  ;;  %382 = vmatpush.msrb.mxu0 %v157_v32  ;;  %401 = vmatpush.msrb.mxu1 %v191_v33  ;;  %v102_v22 = vld [vmem:[%s1520_s1 + $0x2b8] sm:$0xff] }
  0x34   :  { %v189_v37 = vld [vmem:[%s1520_s1 + $0x570] sm:$0xff]  ;;  %v251_v40 = vld [vmem:[%s1520_s1 + $0x760] sm:$0xff]  ;;  %423 = vmatpush.msrb.mxu2 %v219_v34  ;;  %442 = vmatpush.msrb.mxu3 %v253_v35  ;;  %v275_v45 = vperm.slane %v1004_v38, 2  ;;  %v273_v49 = vperm.slane %v1004_v38, 0  ;;  %v276_v51 = vperm.slane %v1004_v38, 3  ;;  %v274_v55 = vperm.slane %v1004_v38, 1 }
  0x35   :  { %v217_v39 = vld [vmem:[%s1520_s1 + $0x650] sm:$0xff]  ;;  %v187_v42 = vld [vmem:[%s1520_s1 + $0x560] sm:$0xff]  ;;  %383 = vmatpush.msrb.mxu0 %v155_v36  ;;  %402 = vmatpush.msrb.mxu1 %v189_v37  ;;  %v279_v1 = vperm.slane %v1004_v38, 6  ;;  %v277_v5 = vperm.slane %v1004_v38, 4  ;;  %v280_v7 = vperm.slane %v1004_v38, 7  ;;  %v278_v12 = vperm.slane %v1004_v38, 5 }
  0x36   :  { %v153_v41 = vld [vmem:[%s1520_s1 + $0x450] sm:$0xff]  ;;  %v215_v43 = vld [vmem:[%s1520_s1 + $0x640] sm:$0xff]  ;;  %424 = vmatpush.msrb.mxu2 %v217_v39  ;;  %443 = vmatpush.msrb.mxu3 %v251_v40  ;;  %v74_v23 = vld [vmem:[%s1520_s1 + $0x1d8] sm:$0xff] }
  0x37   :  { %v249_v44 = vld [vmem:[%s1520_s1 + $0x750] sm:$0xff]  ;;  %v151_v46 = vld [vmem:[%s1520_s1 + $0x440] sm:$0xff]  ;;  %384 = vmatpush.msrb.mxu0 %v153_v41  ;;  %403 = vmatpush.msrb.mxu1 %v187_v42  ;;  %v136_v24 = vld [vmem:[%s1520_s1 + $0x3c8] sm:$0xff] }
  0x38   :  { %v185_v47 = vld [vmem:[%s1520_s1 + $0x550] sm:$0xff]  ;;  %425 = vmatpush.msrb.mxu2 %v215_v43  ;;  %444 = vmatpush.msrb.mxu3 %v249_v44  ;;  %v247_v50 = vld [vmem:[%s1520_s1 + $0x740] sm:$0xff]  ;;  %v38_v25 = vld [vmem:[%s1520_s1 + $0xb8] sm:$0xff] }
  0x39   :  { %v213_v48 = vld [vmem:[%s1520_s1 + $0x630] sm:$0xff]  ;;  %350 = vmatmul.f32.vlgmr.msra.gmra.mxu2 %v275_v45  ;;  %385 = vmatpush.msrb.mxu0 %v151_v46  ;;  %v183_v53 = vld [vmem:[%s1520_s1 + $0x540] sm:$0xff]  ;;  %v100_v26 = vld [vmem:[%s1520_s1 + $0x2a8] sm:$0xff] }
  0x3a   :  { %v149_v52 = vld [vmem:[%s1520_s1 + $0x430] sm:$0xff]  ;;  %404 = vmatpush.msrb.mxu1 %v185_v47  ;;  %426 = vmatpush.msrb.mxu2 %v213_v48  ;;  %v211_v54 = vld [vmem:[%s1520_s1 + $0x620] sm:$0xff]  ;;  %v72_v27 = vld [vmem:[%s1520_s1 + $0x1c8] sm:$0xff] }
  0x3b   :  { %445 = vmatpush.msrb.mxu3 %v247_v50  ;;  %310 = vmatmul.f32.vlgmr.msra.gmra.mxu0 %v273_v49  ;;  %v245_v56 = vld [vmem:[%s1520_s1 + $0x730] sm:$0xff]  ;;  %v147_v57 = vld [vmem:[%s1520_s1 + $0x420] sm:$0xff]  ;;  %v134_v28 = vld [vmem:[%s1520_s1 + $0x3b8] sm:$0xff] }
  0x3c   :  { %370 = vmatmul.f32.vlgmr.msra.gmra.mxu3 %v276_v51  ;;  %386 = vmatpush.msrb.mxu0 %v149_v52  ;;  %v181_v58 = vld [vmem:[%s1520_s1 + $0x530] sm:$0xff]  ;;  %v243_v60 = vld [vmem:[%s1520_s1 + $0x720] sm:$0xff]  ;;  %v36_v29 = vld [vmem:[%s1520_s1 + $0xa8] sm:$0xff] }
  0x3d   :  { %405 = vmatpush.msrb.mxu1 %v183_v53  ;;  %427 = vmatpush.msrb.mxu2 %v211_v54  ;;  %v209_v59 = vld [vmem:[%s1520_s1 + $0x610] sm:$0xff]  ;;  %v179_v62 = vld [vmem:[%s1520_s1 + $0x520] sm:$0xff]  ;;  %v98_v30 = vld [vmem:[%s1520_s1 + $0x298] sm:$0xff] }
  0x3e   :  { %446 = vmatpush.msrb.mxu3 %v245_v56  ;;  %330 = vmatmul.f32.vlgmr.msra.gmra.mxu1 %v274_v55  ;;  %v145_v61 = vld [vmem:[%s1520_s1 + $0x410] sm:$0xff]  ;;  %v207_v63 = vld [vmem:[%s1520_s1 + $0x600] sm:$0xff]  ;;  %v70_v31 = vld [vmem:[%s1520_s1 + $0x1b8] sm:$0xff] }
  0x3f   :  { %387 = vmatpush.msrb.mxu0 %v147_v57  ;;  %406 = vmatpush.msrb.mxu1 %v181_v58  ;;  %v241_v0 = vld [vmem:[%s1520_s1 + $0x710] sm:$0xff]  ;;  %v143_v2 = vld [vmem:[%s1520_s1 + $0x400] sm:$0xff]  ;;  %v132_v32 = vld [vmem:[%s1520_s1 + $0x3a8] sm:$0xff] }
  0x40   :  { %428 = vmatpush.msrb.mxu2 %v209_v59  ;;  %447 = vmatpush.msrb.mxu3 %v243_v60  ;;  %v177_v4 = vld [vmem:[%s1520_s1 + $0x510] sm:$0xff]  ;;  %v239_v6 = vld [vmem:[%s1520_s1 + $0x700] sm:$0xff]  ;;  %v34_v33 = vld [vmem:[%s1520_s1 + $0x98] sm:$0xff] }
  0x41   :  { %388 = vmatpush.msrb.mxu0 %v145_v61  ;;  %407 = vmatpush.msrb.mxu1 %v179_v62  ;;  %v175_v11 = vld [vmem:[%s1520_s1 + $0x500] sm:$0xff]  ;;  %v96_v34 = vld [vmem:[%s1520_s1 + $0x288] sm:$0xff]  ;;  %v130_v36 = vld [vmem:[%s1520_s1 + $0x398] sm:$0xff] }
  0x42   :  { %429 = vmatpush.msrb.mxu2 %v207_v63  ;;  %448 = vmatpush.msrb.mxu3 %v241_v0  ;;  %v68_v35 = vld [vmem:[%s1520_s1 + $0x1a8] sm:$0xff]  ;;  %v94_v39 = vld [vmem:[%s1520_s1 + $0x278] sm:$0xff] }
  0x43   :  { %430 = vmatmul.f32.vlgmr.msrb.gmra.mxu2 %v279_v1  ;;  %389 = vmatpush.msrb.mxu0 %v143_v2  ;;  %v32_v37 = vld [vmem:[%s1520_s1 + $0x88] sm:$0xff]  ;;  %v66_v40 = vld [vmem:[%s1520_s1 + $0x198] sm:$0xff] }
  0x44   :  { %494 = vmatpush.msra.mxu2 %v110_v3  ;;  %408 = vmatpush.msrb.mxu1 %v177_v4  ;;  %v128_v41 = vld [vmem:[%s1520_s1 + $0x388] sm:$0xff]  ;;  %v30_v42 = vld [vmem:[%s1520_s1 + $0x78] sm:$0xff] }
  0x45   :  { %449 = vmatpush.msrb.mxu3 %v239_v6  ;;  %390 = vmatmul.f32.vlgmr.msrb.gmra.mxu0 %v277_v5  ;;  %v92_v43 = vld [vmem:[%s1520_s1 + $0x268] sm:$0xff]  ;;  %v126_v46 = vld [vmem:[%s1520_s1 + $0x378] sm:$0xff] }
  0x46   :  { %450 = vmatmul.f32.vlgmr.msrb.gmra.mxu3 %v280_v7  ;;  %454 = vmatpush.msra.mxu0 %v46_v8  ;;  %v64_v44 = vld [vmem:[%s1520_s1 + $0x188] sm:$0xff]  ;;  %v90_v48 = vld [vmem:[%s1520_s1 + $0x258] sm:$0xff] }
  0x47   :  { %495 = vmatpush.msra.mxu2 %v108_v9  ;;  %514 = vmatpush.msra.mxu3 %v142_v10  ;;  %v28_v47 = vld [vmem:[%s1520_s1 + $0x68] sm:$0xff]  ;;  %v62_v50 = vld [vmem:[%s1520_s1 + $0x178] sm:$0xff] }
  0x48   :  { %409 = vmatpush.msrb.mxu1 %v175_v11  ;;  %455 = vmatpush.msra.mxu0 %v44_v13  ;;  %v124_v52 = vld [vmem:[%s1520_s1 + $0x368] sm:$0xff]  ;;  %v26_v53 = vld [vmem:[%s1520_s1 + $0x58] sm:$0xff] }
  0x49   :  { %410 = vmatmul.f32.vlgmr.msrb.gmra.mxu1 %v278_v12  ;;  %496 = vmatpush.msra.mxu2 %v106_v14  ;;  %v88_v54 = vld [vmem:[%s1520_s1 + $0x248] sm:$0xff]  ;;  %v122_v57 = vld [vmem:[%s1520_s1 + $0x358] sm:$0xff] }
  0x4a   :  { %474 = vmatpush.msra.mxu1 %v78_v15  ;;  %515 = vmatpush.msra.mxu3 %v140_v16  ;;  %v60_v56 = vld [vmem:[%s1520_s1 + $0x168] sm:$0xff]  ;;  %v86_v59 = vld [vmem:[%s1520_s1 + $0x238] sm:$0xff] }
  0x4b   :  { %456 = vmatpush.msra.mxu0 %v42_v17  ;;  %497 = vmatpush.msra.mxu2 %v104_v18  ;;  %v24_v58 = vld [vmem:[%s1520_s1 + $0x48] sm:$0xff]  ;;  %v58_v60 = vld [vmem:[%s1520_s1 + $0x158] sm:$0xff] }
  0x4c   :  { %475 = vmatpush.msra.mxu1 %v76_v19  ;;  %516 = vmatpush.msra.mxu3 %v138_v20  ;;  %v120_v61 = vld [vmem:[%s1520_s1 + $0x348] sm:$0xff]  ;;  %v22_v62 = vld [vmem:[%s1520_s1 + $0x38] sm:$0xff] }
  0x4d   :  { %457 = vmatpush.msra.mxu0 %v40_v21  ;;  %498 = vmatpush.msra.mxu2 %v102_v22  ;;  %v84_v63 = vld [vmem:[%s1520_s1 + $0x228] sm:$0xff]  ;;  %v118_v2 = vld [vmem:[%s1520_s1 + $0x338] sm:$0xff] }
  0x4e   :  { %476 = vmatpush.msra.mxu1 %v74_v23  ;;  %517 = vmatpush.msra.mxu3 %v136_v24  ;;  %v56_v0 = vld [vmem:[%s1520_s1 + $0x148] sm:$0xff]  ;;  %v82_v4 = vld [vmem:[%s1520_s1 + $0x218] sm:$0xff] }
  0x4f   :  { %458 = vmatpush.msra.mxu0 %v38_v25  ;;  %499 = vmatpush.msra.mxu2 %v100_v26  ;;  %v20_v3 = vld [vmem:[%s1520_s1 + $0x28] sm:$0xff]  ;;  %v54_v6 = vld [vmem:[%s1520_s1 + $0x138] sm:$0xff] }
  0x50   :  { %477 = vmatpush.msra.mxu1 %v72_v27  ;;  %518 = vmatpush.msra.mxu3 %v134_v28  ;;  %v116_v8 = vld [vmem:[%s1520_s1 + $0x328] sm:$0xff]  ;;  %v18_v9 = vld [vmem:[%s1520_s1 + $0x18] sm:$0xff] }
  0x51   :  { %459 = vmatpush.msra.mxu0 %v36_v29  ;;  %500 = vmatpush.msra.mxu2 %v98_v30  ;;  %v80_v10 = vld [vmem:[%s1520_s1 + $0x208] sm:$0xff]  ;;  %v114_v13 = vld [vmem:[%s1520_s1 + $0x318] sm:$0xff] }
  0x52   :  { %478 = vmatpush.msra.mxu1 %v70_v31  ;;  %519 = vmatpush.msra.mxu3 %v132_v32  ;;  %v52_v11 = vld [vmem:[%s1520_s1 + $0x128] sm:$0xff]  ;;  %v238_v14 = vld [vmem:[%s1520_s1 + $0x6f8] sm:$0xff] }
  0x53   :  { %460 = vmatpush.msra.mxu0 %v34_v33  ;;  %501 = vmatpush.msra.mxu2 %v96_v34  ;;  %v16_v15 = vld [vmem:[%s1520_s1 + $0x8] sm:$0xff]  ;;  %v50_v16 = vld [vmem:[%s1520_s1 + $0x118] sm:$0xff] }
  0x54   :  { %479 = vmatpush.msra.mxu1 %v68_v35  ;;  %520 = vmatpush.msra.mxu3 %v130_v36  ;;  %v112_v17 = vld [vmem:[%s1520_s1 + $0x308] sm:$0xff]  ;;  %v174_v18 = vld [vmem:[%s1520_s1 + $0x4f8] sm:$0xff] }
  0x55   :  { %461 = vmatpush.msra.mxu0 %v32_v37  ;;  %502 = vmatpush.msra.mxu2 %v94_v39  ;;  %v236_v19 = vld [vmem:[%s1520_s1 + $0x6e8] sm:$0xff]  ;;  %v270_v20 = vld [vmem:[%s1520_s1 + $0x7f8] sm:$0xff] }
  0x56   :  { %480 = vmatpush.msra.mxu1 %v66_v40  ;;  %521 = vmatpush.msra.mxu3 %v128_v41  ;;  %v48_v21 = vld [vmem:[%s1520_s1 + $0x108] sm:$0xff]  ;;  %v206_v23 = vld [vmem:[%s1520_s1 + $0x5f8] sm:$0xff] }
  0x57   :  { %462 = vmatpush.msra.mxu0 %v30_v42  ;;  %503 = vmatpush.msra.mxu2 %v92_v43  ;;  %v172_v22 = vld [vmem:[%s1520_s1 + $0x4e8] sm:$0xff]  ;;  %v234_v24 = vld [vmem:[%s1520_s1 + $0x6d8] sm:$0xff] }
  0x58   :  { %481 = vmatpush.msra.mxu1 %v64_v44  ;;  %522 = vmatpush.msra.mxu3 %v126_v46  ;;  %v268_v25 = vld [vmem:[%s1520_s1 + $0x7e8] sm:$0xff]  ;;  %v170_v26 = vld [vmem:[%s1520_s1 + $0x4d8] sm:$0xff] }
  0x59   :  { %463 = vmatpush.msra.mxu0 %v28_v47  ;;  %504 = vmatpush.msra.mxu2 %v90_v48  ;;  %v204_v27 = vld [vmem:[%s1520_s1 + $0x5e8] sm:$0xff]  ;;  %v266_v29 = vld [vmem:[%s1520_s1 + $0x7d8] sm:$0xff] }
  0x5a   :  { %482 = vmatpush.msra.mxu1 %v62_v50  ;;  %523 = vmatpush.msra.mxu3 %v124_v52  ;;  %v232_v28 = vld [vmem:[%s1520_s1 + $0x6c8] sm:$0xff]  ;;  %v202_v31 = vld [vmem:[%s1520_s1 + $0x5d8] sm:$0xff] }
  0x5b   :  { %464 = vmatpush.msra.mxu0 %v26_v53  ;;  %505 = vmatpush.msra.mxu2 %v88_v54  ;;  %v168_v30 = vld [vmem:[%s1520_s1 + $0x4c8] sm:$0xff]  ;;  %v230_v32 = vld [vmem:[%s1520_s1 + $0x6b8] sm:$0xff] }
  0x5c   :  { %483 = vmatpush.msra.mxu1 %v60_v56  ;;  %524 = vmatpush.msra.mxu3 %v122_v57  ;;  %v264_v33 = vld [vmem:[%s1520_s1 + $0x7c8] sm:$0xff]  ;;  %v166_v34 = vld [vmem:[%s1520_s1 + $0x4b8] sm:$0xff] }
  0x5d   :  { %465 = vmatpush.msra.mxu0 %v24_v58  ;;  %506 = vmatpush.msra.mxu2 %v86_v59  ;;  %v200_v35 = vld [vmem:[%s1520_s1 + $0x5c8] sm:$0xff]  ;;  %v262_v37 = vld [vmem:[%s1520_s1 + $0x7b8] sm:$0xff] }
  0x5e   :  { %484 = vmatpush.msra.mxu1 %v58_v60  ;;  %525 = vmatpush.msra.mxu3 %v120_v61  ;;  %v228_v36 = vld [vmem:[%s1520_s1 + $0x6a8] sm:$0xff]  ;;  %v198_v40 = vld [vmem:[%s1520_s1 + $0x5b8] sm:$0xff] }
  0x5f   :  { %466 = vmatpush.msra.mxu0 %v22_v62  ;;  %507 = vmatpush.msra.mxu2 %v84_v63  ;;  %v164_v39 = vld [vmem:[%s1520_s1 + $0x4a8] sm:$0xff]  ;;  %v226_v41 = vld [vmem:[%s1520_s1 + $0x698] sm:$0xff] }
  0x60   :  { %485 = vmatpush.msra.mxu1 %v56_v0  ;;  %526 = vmatpush.msra.mxu3 %v118_v2  ;;  %v260_v42 = vld [vmem:[%s1520_s1 + $0x7a8] sm:$0xff]  ;;  %v162_v43 = vld [vmem:[%s1520_s1 + $0x498] sm:$0xff] }
  0x61   :  { %467 = vmatpush.msra.mxu0 %v20_v3  ;;  %508 = vmatpush.msra.mxu2 %v82_v4  ;;  %v196_v44 = vld [vmem:[%s1520_s1 + $0x5a8] sm:$0xff]  ;;  %v258_v47 = vld [vmem:[%s1520_s1 + $0x798] sm:$0xff] }
  0x62   :  { %486 = vmatpush.msra.mxu1 %v54_v6  ;;  %527 = vmatpush.msra.mxu3 %v116_v8  ;;  %v224_v46 = vld [vmem:[%s1520_s1 + $0x688] sm:$0xff]  ;;  %v194_v50 = vld [vmem:[%s1520_s1 + $0x598] sm:$0xff] }
  0x63   :  { %468 = vmatpush.msra.mxu0 %v18_v9  ;;  %509 = vmatpush.msra.mxu2 %v80_v10  ;;  %v160_v48 = vld [vmem:[%s1520_s1 + $0x488] sm:$0xff]  ;;  %v222_v52 = vld [vmem:[%s1520_s1 + $0x678] sm:$0xff] }
  0x64   :  { %487 = vmatpush.msra.mxu1 %v52_v11  ;;  %528 = vmatpush.msra.mxu3 %v114_v13  ;;  %v256_v53 = vld [vmem:[%s1520_s1 + $0x788] sm:$0xff]  ;;  %v158_v54 = vld [vmem:[%s1520_s1 + $0x478] sm:$0xff] }
  0x65   :  { %574 = vmatpush.msrb.mxu2 %v238_v14  ;;  %469 = vmatpush.msra.mxu0 %v16_v15  ;;  %v192_v56 = vld [vmem:[%s1520_s1 + $0x588] sm:$0xff]  ;;  %v254_v58 = vld [vmem:[%s1520_s1 + $0x778] sm:$0xff] }
  0x66   :  { %488 = vmatpush.msra.mxu1 %v50_v16  ;;  %529 = vmatpush.msra.mxu3 %v112_v17  ;;  %v220_v57 = vld [vmem:[%s1520_s1 + $0x668] sm:$0xff]  ;;  %v190_v60 = vld [vmem:[%s1520_s1 + $0x578] sm:$0xff] }
  0x67   :  { %534 = vmatpush.msrb.mxu0 %v174_v18  ;;  %575 = vmatpush.msrb.mxu2 %v236_v19  ;;  %v156_v59 = vld [vmem:[%s1520_s1 + $0x468] sm:$0xff]  ;;  %v218_v61 = vld [vmem:[%s1520_s1 + $0x658] sm:$0xff] }
  0x68   :  { %594 = vmatpush.msrb.mxu3 %v270_v20  ;;  %489 = vmatpush.msra.mxu1 %v48_v21  ;;  %v252_v62 = vld [vmem:[%s1520_s1 + $0x768] sm:$0xff]  ;;  %v154_v63 = vld [vmem:[%s1520_s1 + $0x458] sm:$0xff] }
  0x69   :  { %535 = vmatpush.msrb.mxu0 %v172_v22  ;;  %576 = vmatpush.msrb.mxu2 %v234_v24  ;;  %v188_v0 = vld [vmem:[%s1520_s1 + $0x568] sm:$0xff]  ;;  %v250_v3 = vld [vmem:[%s1520_s1 + $0x758] sm:$0xff] }
  0x6a   :  { %554 = vmatpush.msrb.mxu1 %v206_v23  ;;  %595 = vmatpush.msrb.mxu3 %v268_v25  ;;  %v216_v2 = vld [vmem:[%s1520_s1 + $0x648] sm:$0xff]  ;;  %v186_v6 = vld [vmem:[%s1520_s1 + $0x558] sm:$0xff] }
  0x6b   :  { %536 = vmatpush.msrb.mxu0 %v170_v26  ;;  %577 = vmatpush.msrb.mxu2 %v232_v28  ;;  %v152_v4 = vld [vmem:[%s1520_s1 + $0x448] sm:$0xff]  ;;  %v214_v8 = vld [vmem:[%s1520_s1 + $0x638] sm:$0xff] }
  0x6c   :  { %555 = vmatpush.msrb.mxu1 %v204_v27  ;;  %596 = vmatpush.msrb.mxu3 %v266_v29  ;;  %v248_v9 = vld [vmem:[%s1520_s1 + $0x748] sm:$0xff]  ;;  %v150_v10 = vld [vmem:[%s1520_s1 + $0x438] sm:$0xff] }
  0x6d   :  { %537 = vmatpush.msrb.mxu0 %v168_v30  ;;  %578 = vmatpush.msrb.mxu2 %v230_v32  ;;  %v184_v11 = vld [vmem:[%s1520_s1 + $0x548] sm:$0xff]  ;;  %v182_v15 = vld [vmem:[%s1520_s1 + $0x538] sm:$0xff] }
  0x6e   :  { %556 = vmatpush.msrb.mxu1 %v202_v31  ;;  %597 = vmatpush.msrb.mxu3 %v264_v33  ;;  %v212_v13 = vld [vmem:[%s1520_s1 + $0x628] sm:$0xff]  ;;  %v242_v19 = vld [vmem:[%s1520_s1 + $0x718] sm:$0xff] }
  0x6f   :  { %538 = vmatpush.msrb.mxu0 %v166_v34  ;;  %579 = vmatpush.msrb.mxu2 %v228_v36  ;;  %v148_v14 = vld [vmem:[%s1520_s1 + $0x428] sm:$0xff]  ;;  %v178_v20 = vld [vmem:[%s1520_s1 + $0x518] sm:$0xff] }
  0x70   :  { %557 = vmatpush.msrb.mxu1 %v200_v35  ;;  %598 = vmatpush.msrb.mxu3 %v262_v37  ;;  %v244_v16 = vld [vmem:[%s1520_s1 + $0x728] sm:$0xff] }
  0x71   :  { %539 = vmatpush.msrb.mxu0 %v164_v39  ;;  %580 = vmatpush.msrb.mxu2 %v226_v41  ;;  %v180_v17 = vld [vmem:[%s1520_s1 + $0x528] sm:$0xff] }
  0x72   :  { %558 = vmatpush.msrb.mxu1 %v198_v40  ;;  %599 = vmatpush.msrb.mxu3 %v260_v42  ;;  %v208_v18 = vld [vmem:[%s1520_s1 + $0x608] sm:$0xff] }
  0x73   :  { %540 = vmatpush.msrb.mxu0 %v162_v43  ;;  %581 = vmatpush.msrb.mxu2 %v224_v46  ;;  %v240_v21 = vld [vmem:[%s1520_s1 + $0x708] sm:$0xff] }
  0x74   :  { %559 = vmatpush.msrb.mxu1 %v196_v44  ;;  %600 = vmatpush.msrb.mxu3 %v258_v47  ;;  %v176_v22 = vld [vmem:[%s1520_s1 + $0x508] sm:$0xff] }
  0x75   :  { %541 = vmatpush.msrb.mxu0 %v160_v48  ;;  %582 = vmatpush.msrb.mxu2 %v222_v52 }
  0x76   :  { %560 = vmatpush.msrb.mxu1 %v194_v50  ;;  %601 = vmatpush.msrb.mxu3 %v256_v53 }
  0x77   :  { %542 = vmatpush.msrb.mxu0 %v158_v54  ;;  %583 = vmatpush.msrb.mxu2 %v220_v57 }
  0x78   :  { %561 = vmatpush.msrb.mxu1 %v192_v56  ;;  %602 = vmatpush.msrb.mxu3 %v254_v58 }
  0x79   :  { %543 = vmatpush.msrb.mxu0 %v156_v59  ;;  %584 = vmatpush.msrb.mxu2 %v218_v61 }
  0x7a   :  { %562 = vmatpush.msrb.mxu1 %v190_v60  ;;  %603 = vmatpush.msrb.mxu3 %v252_v62 }
  0x7b   :  { %544 = vmatpush.msrb.mxu0 %v154_v63  ;;  %585 = vmatpush.msrb.mxu2 %v216_v2 }
  0x7c   :  { %563 = vmatpush.msrb.mxu1 %v188_v0  ;;  %604 = vmatpush.msrb.mxu3 %v250_v3 }
  0x7d   :  { %510 = vmatmul.f32.vlgmr.msra.gmra.mxu2 %v275_v45  ;;  %545 = vmatpush.msrb.mxu0 %v152_v4  ;;  %v246_v45 = vld [vmem:[%s1520_s1 + $0x738] sm:$0xff] }
  0x7e   :  { %564 = vmatpush.msrb.mxu1 %v186_v6  ;;  %586 = vmatpush.msrb.mxu2 %v214_v8 }
  0x7f   :  { %605 = vmatpush.msrb.mxu3 %v248_v9  ;;  %470 = vmatmul.f32.vlgmr.msra.gmra.mxu0 %v273_v49  ;;  %v210_v49 = vld [vmem:[%s1520_s1 + $0x618] sm:$0xff] }
  0x80   :  { %530 = vmatmul.f32.vlgmr.msra.gmra.mxu3 %v276_v51  ;;  %546 = vmatpush.msrb.mxu0 %v150_v10  ;;  %v146_v51 = vld [vmem:[%s1520_s1 + $0x418] sm:$0xff] }
  0x81   :  { %565 = vmatpush.msrb.mxu1 %v184_v11  ;;  %587 = vmatpush.msrb.mxu2 %v212_v13 }
  0x82   :  { %606 = vmatpush.msrb.mxu3 %v246_v45  ;;  %490 = vmatmul.f32.vlgmr.msra.gmra.mxu1 %v274_v55  ;;  %v144_v55 = vld [vmem:[%s1520_s1 + $0x408] sm:$0xff] }
  0x83   :  { %547 = vmatpush.msrb.mxu0 %v148_v14  ;;  %566 = vmatpush.msrb.mxu1 %v182_v15 }
  0x84   :  { %588 = vmatpush.msrb.mxu2 %v210_v49  ;;  %607 = vmatpush.msrb.mxu3 %v244_v16 }
  0x85   :  { %548 = vmatpush.msrb.mxu0 %v146_v51  ;;  %567 = vmatpush.msrb.mxu1 %v180_v17 }
  0x86   :  { %589 = vmatpush.msrb.mxu2 %v208_v18  ;;  %608 = vmatpush.msrb.mxu3 %v242_v19  ;;  %v658_v18 = vlaneseq }
  0x87   :  { %590 = vmatmul.f32.vlgmr.msrb.gmra.mxu2 %v279_v1  ;;  %549 = vmatpush.msrb.mxu0 %v144_v55  ;;  %v271_v1 = vld [vmem:[%s1522_s2] sm:$0x3] }
  0x88   :  { %568 = vmatpush.msrb.mxu1 %v178_v20  ;;  %609 = vmatpush.msrb.mxu3 %v240_v21  ;;  %v290_v23 = vperm.slane %v271_v1, 0  ;;  %v291_v36 = vperm.slane %v271_v1, 1  ;;  %vm660_vm9 = vcmp.lt.s32.totalorder %v658_v18, 256 }
  0x89   :  { %550 = vmatmul.f32.vlgmr.msrb.gmra.mxu0 %v277_v5  ;;  %610 = vmatmul.f32.vlgmr.msrb.gmra.mxu3 %v280_v7 }
  0x8a   :  { %569 = vmatpush.msrb.mxu1 %v176_v22 }
  0x8b   :  { %570 = vmatmul.f32.vlgmr.msrb.gmra.mxu1 %v278_v12 }
  0xb8   :  { %v311_v24 = vpop.f32.mrf.mxu0 }
  0xb9   :  { %v312_v25 = vadd.f32 %v311_v24, %v290_v23 }
  0xbb   :  { %v331_v26 = vpop.f32.mrf.mxu1 }
  0xbc   :  { %v332_v27 = vadd.f32 %v331_v26, %v312_v25  ;;  %v351_v28 = vpop.f32.mrf.mxu2 }
  0xbe   :  { %v352_v29 = vadd.f32 %v351_v28, %v332_v27 }
  0xbf   :  { %v371_v30 = vpop.f32.mrf.mxu3 }
  0xc0   :  { %v372_v5 = vadd.f32 %v371_v30, %v352_v29 }
  0xc2   :  { %v391_v31 = vpop.f32.mrf.mxu0 }
  0xc3   :  { %v392_v32 = vadd.f32 %v391_v31, %v372_v5 }
  0xc6   :  { %v411_v7 = vpop.f32.mrf.mxu1  ;;  %v431_v34 = vpop.f32.mrf.mxu2 }
  0xc7   :  { %v412_v33 = vadd.f32 %v411_v7, %v392_v32 }
  0xc9   :  { %v432_v38 = vadd.f32 %v431_v34, %v412_v33  ;;  %v451_v12 = vpop.f32.mrf.mxu3 }
  0xcb   :  { %v452_v35 = vadd.f32 %v451_v12, %v432_v38 }
  0xcd   :  { %v614_v39 = vsub.f32 0.0, %v452_v35 }
  0xcf   :  { %v616_v44 = vmul.f32 1.442695, %v614_v39 }
  0xd1   :  { %667 = vpow2.f32 %v616_v44 }
  0xd7   :  { %v668_v57 = vpop.eup %667 }
  0xd8   :  { %v620_v61 = vadd.f32 1.0, %v668_v57 }
  0xda   :  { %669 = vrcp.f32 %v620_v61  ;;  %vm627_vm0 = vweird.f32 %v620_v61  ;;  %v633_v49 = vand.u32 2147483648, %v620_v61  ;;  %v631_v51 = vand.u32 2147483647, %v620_v61 }
  0xdc   :  { %v634_v21 = vor.u32 1.1754944e-38, %v633_v49  ;;  %vm632_vm8 = vcmp.eq.f32.partialorder %v631_v51, 8.507059e+37 }
  0xe0   :  { %v670_v0 = vpop.eup %669 }
  0xe1   :  { %v623_v4 = vmul.f32 %v670_v0, %v620_v61  ;;  %vm628_vm1 = vweird.f32 %v670_v0 }
  0xe2   :  { %vm1511_vm3 = vmor %vm627_vm0, %vm628_vm1 }
  0xe3   :  { %v624_v6 = vsub.f32 1.0, %v623_v4 }
  0xe5   :  { %v625_v9 = vmul.f32 %v670_v0, %v624_v6 }
  0xe7   :  { %v626_v45 = vadd.f32 %v670_v0, %v625_v9 }
  0xe9   :  { %v630_v55 = vsel %vm1511_vm3, %v670_v0, %v626_v45 }
  0xea   :  { %v635_v23 = vsel %vm632_vm8, %v634_v21, %v630_v55 }
  0xfc   :  { %v471_v37 = vpop.f32.mrf.mxu0 }
  0xfd   :  { %v472_v40 = vadd.f32 %v471_v37, %v291_v36 }
  0xff   :  { %v491_v41 = vpop.f32.mrf.mxu1 }
 0x100   :  { %v492_v42 = vadd.f32 %v491_v41, %v472_v40  ;;  %v511_v43 = vpop.f32.mrf.mxu2 }
 0x102   :  { %v512_v46 = vadd.f32 %v511_v43, %v492_v42 }
 0x103   :  { %v531_v47 = vpop.f32.mrf.mxu3 }
 0x104   :  { %v532_v48 = vadd.f32 %v531_v47, %v512_v46 }
 0x106   :  { %v551_v50 = vpop.f32.mrf.mxu0 }
 0x107   :  { %v552_v52 = vadd.f32 %v551_v50, %v532_v48 }
 0x108   :  { %v571_v53 = vpop.f32.mrf.mxu1 }
 0x109   :  { %v572_v54 = vadd.f32 %v571_v53, %v552_v52 }
 0x10a   :  { %v591_v56 = vpop.f32.mrf.mxu2 }
 0x10b   :  { %v592_v58 = vadd.f32 %v591_v56, %v572_v54 }
 0x10c   :  { %v611_v59 = vpop.f32.mrf.mxu3 }
 0x10d   :  { %v612_v60 = vadd.f32 %v611_v59, %v592_v58 }
 0x10f   :  { %v615_v62 = vsub.f32 0.0, %v612_v60 }
 0x111   :  { %v618_v63 = vmul.f32 1.442695, %v615_v62 }
 0x113   :  { %671 = vpow2.f32 %v618_v63 }
 0x119   :  { %v672_v2 = vpop.eup %671 }
 0x11a   :  { %v621_v3 = vadd.f32 1.0, %v672_v2 }
 0x11c   :  { %673 = vrcp.f32 %v621_v3  ;;  %v648_v13 = vand.u32 2147483648, %v621_v3  ;;  %v646_v15 = vand.u32 2147483647, %v621_v3  ;;  %vm642_vm4 = vweird.f32 %v621_v3 }
 0x11e   :  { %v649_v19 = vor.u32 1.1754944e-38, %v648_v13  ;;  %vm647_vm6 = vcmp.eq.f32.partialorder %v646_v15, 8.507059e+37 }
 0x122   :  { %v674_v8 = vpop.eup %673 }
 0x123   :  { %v638_v10 = vmul.f32 %v674_v8, %v621_v3  ;;  %vm643_vm2 = vweird.f32 %v674_v8 }
 0x124   :  { %vm644_vm5 = vmor %vm642_vm4, %vm643_vm2 }
 0x125   :  { %v639_v11 = vsub.f32 1.0, %v638_v10 }
 0x127   :  { %v640_v14 = vmul.f32 %v674_v8, %v639_v11 }
 0x129   :  { %v641_v17 = vadd.f32 %v674_v8, %v640_v14 }
 0x12b   :  { %v645_v20 = vsel %vm644_vm5, %v674_v8, %v641_v17 }
 0x12c   :  { %v650_v22 = vsel %vm647_vm6, %v649_v19, %v645_v20 }
 0x12d   :  { %v654_v1 = vrot.slane %v650_v22, 7 }
 0x12f   :  { %v656_v24 = vsel %vm655_vm7, %v635_v23, %v654_v1 }
 0x130   :  { %662 = vst.msk [vmem:[%s1523_s3] sm:$0x3] %vm660_vm9, %v656_v24 }

</bundles_post_ra>
